<compile_context>
chip_gen: v5e
topology: v5e:2x2
jax: 0.10.0
libtpu: 0.0.40
codegen_flags: <defaults>
</compile_context>

<pallas_src>
import math

import jax
import jax.numpy as jnp
from jax.experimental import pallas as pl
from jax.experimental.pallas import tpu as pltpu

NUM_FREQUENCIES = 4          # NF
EMBED_DIM = 64               # E
FOLD = 16                    # R: batch rows folded into the lane axis
MAX_TILE_VIEW_ROWS = 512     # view rows per grid step (512 * R*E*4 B = 2 MiB out/step)


def _cdiv(a, b):
    return (a + b - 1) // b


def _round_up(x, m):
    return ((x + m - 1) // m) * m


# ---- Pallas kernel ----------------------------------------------------------
def time_encoding_kernel(t_ref, freqs_ref, phases_ref, w_ref, b_ref, out_ref):
    # t_ref:      (TB, 2*R*NF) col (h*R*NF + r*NF + f) = t[view_row*R + r]
    #                          (both lane-halves identical)
    # freqs_ref:  (1, 2*R*NF)  col ... = freqs[f]
    # phases_ref: (1, 2*R*NF)  first half phases[f], second half phases[f]+pi/2
    # w_ref:      (2*R*NF, R*E) = [kron(I_R, Wsin); kron(I_R, Wcos)]
    # b_ref:      (1, R*E)     = tile(b, R)
    # out_ref:    (TB, R*E)    cols r*E..(r+1)*E-1 = output row (view_row*R + r)
    # sin over the full 128-lane vreg produces [sin(ang) | cos(ang)] at once
    # (cos(x) == sin(x + pi/2), folded into the phases of the second half).
    feats = jnp.sin(t_ref[...] * freqs_ref[...] + phases_ref[...])   # (TB, 2*R*NF)
    out = jnp.dot(feats, w_ref[...], preferred_element_type=jnp.float32) + b_ref[...]
    out_ref[...] = out.astype(out_ref.dtype)


# ---- one-time parameter packing (outside the per-call path) -----------------
def pack_params(params, fold=FOLD):
    """Repack module params into the lane-folded layout used by the kernel."""
    E, two_nf = params['w'].shape
    nf = two_nf // 2
    R = fold
    wsin = jnp.transpose(params['w'][:, :nf]).astype(jnp.float32)      # (NF, E)
    wcos = jnp.transpose(params['w'][:, nf:]).astype(jnp.float32)      # (NF, E)
    eye = jnp.eye(R, dtype=jnp.float32)
    w_packed = jnp.concatenate(
        [jnp.kron(eye, wsin), jnp.kron(eye, wcos)], axis=0)            # (2*R*NF, R*E)
    freqs_r = jnp.tile(params['freqs'].astype(jnp.float32), R)         # (R*NF,)
    phases_r = jnp.tile(params['phases'].astype(jnp.float32), R)       # (R*NF,)
    return {
        'freqs': jnp.concatenate([freqs_r, freqs_r])[None, :],                       # (1, 2*R*NF)
        'phases': jnp.concatenate([phases_r, phases_r + 0.5 * math.pi])[None, :],    # (1, 2*R*NF)
        'w': w_packed,                                                                # (2*R*NF, R*E)
        'b': jnp.tile(params['b'].astype(jnp.float32), R)[None, :],                   # (1, R*E)
    }


# ---- wrapper ----------------------------------------------------------------
@jax.jit
def time_encoding_forward(packed, normalized_months):
    """normalized_months: (B,) f32 in [0, 1]. Returns (B, EMBED_DIM) f32."""
    B = normalized_months.shape[0]
    R, NF, E = FOLD, NUM_FREQUENCIES, EMBED_DIM

    # Tile sizing: each view row carries R original rows (R*E*4 B of output).
    # Use big tiles to amortize per-step overhead, but keep >= 2 grid steps
    # when B allows so the "parallel" axis shards over v7x's two TensorCores.
    view_rows = _cdiv(B, R)
    tb = min(MAX_TILE_VIEW_ROWS, max(8, _round_up(_cdiv(view_rows, 2), 8)))
    n_tiles = _cdiv(view_rows, tb)
    Bp = n_tiles * tb * R

    # Lane-folded time input (both halves identical; second half pairs with the
    # +pi/2 phases to produce the cos features): shape (Bp//R, 2*R*NF).
    t_pad = jnp.pad(normalized_months.astype(jnp.float32), (0, Bp - B))
    t_half = jnp.repeat(t_pad, NF).reshape(Bp // R, R * NF)
    t_rep = jnp.concatenate([t_half, t_half], axis=-1)

    out_view = pl.pallas_call(
        time_encoding_kernel,
        out_shape=jax.ShapeDtypeStruct((Bp // R, R * E), jnp.float32),
        grid=(n_tiles,),
        in_specs=[
            pl.BlockSpec((tb, 2 * R * NF), lambda i: (i, 0)),         # t: tiled over batch
            pl.BlockSpec((1, 2 * R * NF), lambda i: (0, 0)),          # freqs: resident
            pl.BlockSpec((1, 2 * R * NF), lambda i: (0, 0)),          # phases: resident
            pl.BlockSpec((2 * R * NF, R * E), lambda i: (0, 0)),      # W (block-diag): resident
            pl.BlockSpec((1, R * E), lambda i: (0, 0)),               # bias: resident
        ],
        out_specs=pl.BlockSpec((tb, R * E), lambda i: (i, 0)),
        compiler_params=pltpu.CompilerParams(
            dimension_semantics=("parallel",),        # megacore sharding on v7x
        ),
    )(t_rep, packed['freqs'], packed['phases'], packed['w'], packed['b'])

    # (Bp//R, R*E) is a pure row-major view of (Bp, E): reshape, then drop pad.
    return out_view.reshape(Bp, E)[:B]


# ---- pure-JAX reference (mirrors the PyTorch forward exactly) ---------------
def time_encoding_ref(params, normalized_months):
    tm = normalized_months[:, None] * params['freqs']
    ff = jnp.concatenate(
        [jnp.sin(tm + params['phases']), jnp.cos(tm + params['phases'])], axis=-1)
    return ff @ params['w'].T + params['b']


# ---- parameter construction (matches nn.Module init semantics) --------------
def init_params(key, embed_dim=EMBED_DIM, num_frequencies=NUM_FREQUENCIES):
    k1, k2, k3, k4 = jax.random.split(key, 4)
    return {
        # freqs = randn(NF) * 2*pi, phases = randn(NF)
        'freqs': (jax.random.normal(k1, (num_frequencies,)) * 2.0 * math.pi
                  ).astype(jnp.float32),
        'phases': jax.random.normal(k2, (num_frequencies,)).astype(jnp.float32),
        # nn.Linear(2*NF, E): weight (E, 2*NF), bias (E,)
        'w': (jax.random.normal(k3, (embed_dim, 2 * num_frequencies))
              * (1.0 / math.sqrt(2 * num_frequencies))).astype(jnp.float32),
        'b': (0.01 * jax.random.normal(k4, (embed_dim,))).astype(jnp.float32),
    }


# ---- demo -------------------------------------------------------------------
if __name__ == "__main__":
    BATCH = 200   # pads to 256 -> 2 grid steps of 8 view rows (128 orig rows) each

    key = jax.random.PRNGKey(0)
    k_params, k_months = jax.random.split(key)

    params = init_params(k_params)
    packed = pack_params(params)          # one-time packing, outside the hot path
    normalized_months = jax.random.uniform(k_months, (BATCH,), dtype=jnp.float32)

    out = time_encoding_forward(packed, normalized_months)
    jax.block_until_ready(out)

    ref = time_encoding_ref(params, normalized_months)
    assert out.shape == (BATCH, EMBED_DIM)
    assert bool(jnp.all(jnp.isfinite(out)))
    assert bool(jnp.allclose(out, ref, atol=1e-4, rtol=1e-4))
    print("KERNEL_OK")
</pallas_src>

<mosaic_0001>
module attributes {stable_mosaic.version = 11 : i64} {
  func.func @time_encoding_kernel(%arg0: i32, %arg1: memref<8x128xf32, #tpu.memory_space<vmem>>, %arg2: memref<1x128xf32, #tpu.memory_space<vmem>>, %arg3: memref<1x128xf32, #tpu.memory_space<vmem>>, %arg4: memref<128x1024xf32, #tpu.memory_space<vmem>>, %arg5: memref<1x1024xf32, #tpu.memory_space<vmem>>, %arg6: memref<8x1024xf32, #tpu.memory_space<vmem>>) attributes {dimension_semantics = [#tpu.dimension_semantics<parallel>], iteration_bounds = array<i64: 2>, scalar_prefetch = 0 : i64, scratch_operands = 0 : i64, tpu.core_type = #tpu.core_type<tc>, window_params = [{transform_indices = @transform_0, window_bounds = array<i64: 8, 128>}, {pipeline_mode = #tpu.pipeline_mode<synchronous>, transform_indices = @transform_1, window_bounds = array<i64: 1, 128>}, {pipeline_mode = #tpu.pipeline_mode<synchronous>, transform_indices = @transform_2, window_bounds = array<i64: 1, 128>}, {pipeline_mode = #tpu.pipeline_mode<synchronous>, transform_indices = @transform_3, window_bounds = array<i64: 128, 1024>}, {pipeline_mode = #tpu.pipeline_mode<synchronous>, transform_indices = @transform_4, window_bounds = array<i64: 1, 1024>}, {transform_indices = @transform_5, window_bounds = array<i64: 8, 1024>}]} {
    %c0 = arith.constant 0 : index
    %c0_0 = arith.constant 0 : index
    %0 = vector.load %arg1[%c0, %c0_0] : memref<8x128xf32, #tpu.memory_space<vmem>>, vector<8x128xf32>
    %c0_1 = arith.constant 0 : index
    %c0_2 = arith.constant 0 : index
    %1 = vector.load %arg2[%c0_1, %c0_2] : memref<1x128xf32, #tpu.memory_space<vmem>>, vector<1x128xf32>
    %2 = vector.broadcast %1 : vector<1x128xf32> to vector<8x128xf32>
    %3 = arith.mulf %0, %2 : vector<8x128xf32>
    %c0_3 = arith.constant 0 : index
    %c0_4 = arith.constant 0 : index
    %4 = vector.load %arg3[%c0_3, %c0_4] : memref<1x128xf32, #tpu.memory_space<vmem>>, vector<1x128xf32>
    %5 = vector.broadcast %4 : vector<1x128xf32> to vector<8x128xf32>
    %6 = arith.addf %3, %5 : vector<8x128xf32>
    %7 = math.sin %6 : vector<8x128xf32>
    %c0_5 = arith.constant 0 : index
    %c0_6 = arith.constant 0 : index
    %8 = vector.load %arg4[%c0_5, %c0_6] : memref<128x1024xf32, #tpu.memory_space<vmem>>, vector<128x1024xf32>
    %cst = arith.constant dense<0.000000e+00> : vector<8x1024xf32>
    %9 = tpu.matmul %7, %8, %cst {dimension_numbers = #tpu.dot_dimension_numbers<[1], [0], [0], [1], [0, 0, 1, 1], [], []>} : vector<8x128xf32>, vector<128x1024xf32>, vector<8x1024xf32> -> vector<8x1024xf32>
    %c0_7 = arith.constant 0 : index
    %c0_8 = arith.constant 0 : index
    %10 = vector.load %arg5[%c0_7, %c0_8] : memref<1x1024xf32, #tpu.memory_space<vmem>>, vector<1x1024xf32>
    %11 = vector.broadcast %10 : vector<1x1024xf32> to vector<8x1024xf32>
    %12 = arith.addf %9, %11 : vector<8x1024xf32>
    %c0_9 = arith.constant 0 : index
    %c0_10 = arith.constant 0 : index
    %13 = vector.load %arg6[%c0_9, %c0_10] : memref<8x1024xf32, #tpu.memory_space<vmem>>, vector<8x1024xf32>
    tpu.vector_store %arg6[%c0_9, %c0_10], %12 {strides = array<i32>} : memref<8x1024xf32, #tpu.memory_space<vmem>>, vector<8x1024xf32>,
    return
  }
  func.func @transform_0(%arg0: i32) -> (i32, i32) {
    %c0_i32 = arith.constant 0 : i32
    %c0_i32_0 = arith.constant 0 : i32
    return %arg0, %c0_i32 : i32, i32
  }
  func.func @transform_1(%arg0: i32) -> (i32, i32) {
    %c0_i32 = arith.constant 0 : i32
    %c0_i32_0 = arith.constant 0 : i32
    %c0_i32_1 = arith.constant 0 : i32
    return %c0_i32, %c0_i32_0 : i32, i32
  }
  func.func @transform_2(%arg0: i32) -> (i32, i32) {
    %c0_i32 = arith.constant 0 : i32
    %c0_i32_0 = arith.constant 0 : i32
    %c0_i32_1 = arith.constant 0 : i32
    return %c0_i32, %c0_i32_0 : i32, i32
  }
  func.func @transform_3(%arg0: i32) -> (i32, i32) {
    %c0_i32 = arith.constant 0 : i32
    %c0_i32_0 = arith.constant 0 : i32
    %c0_i32_1 = arith.constant 0 : i32
    return %c0_i32, %c0_i32_0 : i32, i32
  }
  func.func @transform_4(%arg0: i32) -> (i32, i32) {
    %c0_i32 = arith.constant 0 : i32
    %c0_i32_0 = arith.constant 0 : i32
    %c0_i32_1 = arith.constant 0 : i32
    return %c0_i32, %c0_i32_0 : i32, i32
  }
  func.func @transform_5(%arg0: i32) -> (i32, i32) {
    %c0_i32 = arith.constant 0 : i32
    %c0_i32_0 = arith.constant 0 : i32
    return %arg0, %c0_i32 : i32, i32
  }
}

</mosaic_0001>

<bundles_post_ra>
// kernel: time_encoding_forward.1
= control target key start
LH: loop header
LB: loop body
LE: loop exit
PB: predicated region body
PF: predicated region fallthrough
CT: control target
= control target key end

     0   :  { %10 = vsyncpa [#allocation3], 0  ;;  %s914_s18 = smov 0   ;;  %s1017_s0 = inlined_call_operand.vmem [shape: f32[16,128], index: 0, kind: input, shape index: {}]   ;;  %s1018_s1 = inlined_call_operand.vmem [shape: f32[1,128], index: 1, kind: input, shape index: {}]   ;;  %s1019_s2 = inlined_call_operand.vmem [shape: f32[1,128], index: 2, kind: input, shape index: {}]   ;;  %s1020_s3 = inlined_call_operand.hbm [shape: f32[128,1024], index: 3, kind: input, shape index: {}]   ;;  %s1021_s4 = inlined_call_operand.vmem [shape: f32[1,1024], index: 4, kind: input, shape index: {}]   ;;  %s1022_s5 = inlined_call_operand.vmem [shape: f32[16,1024], index: 5, kind: output, shape index: {}]  }
   0x1 LB: > { %s174_s21 = sshll.u32 %s1020_s3, 4  ;;  %s923_s22 = sadd.s32 4294967295, %s872_s18   ;;  %s872_s18 = sphi %s914_s18, %s16_s18   ;;  %s175_s21 = int_to_ptr.hbm [resolvable:$true] %s174_s21 }
   0x2   : > { %p788_p0 = scmp.ge.s32.totalorder %s872_s18, 1  ;;  %p157_p1 = scmp.lt.s32.totalorder %s872_s18, 3 }
   0x3   : > { %p810_p2 = scmp.eq.s32.totalorder %s923_s22, 0  ;;  %s874_s23 = smov [#allocation2]  }
   0x4   : > { %p158_p3 = pnand %p788_p0, %p157_p1  ;;  %s176_s24 = sshll.u32 %s874_s23, 4  ;;  %s177_s24 = int_to_ptr.vmem [resolvable:$true] %s176_s24 }
   0x5   : > { %s875_s25 = smov 1024   ;;  %s876_s26 = smov 64  }
   0x6   : > { %p806_p4 = pneg %p158_p3  ;;  %202 = sbr.rel (%p158_p3) target bundleno = 286 (0x11e), region = 40 }
   0x8   : > { %p807_p5 = pnand %p810_p2, %p806_p4 }
   0xa   : > { %809 = dma.hbm_to_vmem [thread:$0]  (!%p807_p5), %s175_s21, 16384, %s177_s24, [#allocation3], %s875_s25, %s875_s25, %s876_s26  }
   0xb   : > { %867 = dma.done.wait (%p810_p2), [#allocation3], 16384  }
   0xc   : > { %869 = vsyncadd (%p810_p2), [#allocation3], 4294950912  ;;  %v527_v0 = vld [vmem:[#allocation2 + $0x3d0] sm:$0xff]  ;;  %v528_v1 = vld [vmem:[#allocation2 + $0x3d8] sm:$0xff]  ;;  %p230_p6 = scmp.lt.s32.totalorder %s923_s22, 1 }
   0xd   : > { %v519_v2 = vld [vmem:[#allocation2 + $0x390] sm:$0xff]  ;;  %591 = vmatpush.msra.mxu2 %v527_v0  ;;  %611 = vmatpush.msra.mxu3 %v528_v1  ;;  %v520_v3 = vld [vmem:[#allocation2 + $0x398] sm:$0xff]  ;;  %v525_v6 = vld [vmem:[#allocation2 + $0x3c0] sm:$0xff] }
   0xe   : > { %v511_v4 = vld [vmem:[#allocation2 + $0x350] sm:$0xff]  ;;  %v512_v5 = vld [vmem:[#allocation2 + $0x358] sm:$0xff]  ;;  %v526_v7 = vld [vmem:[#allocation2 + $0x3c8] sm:$0xff]  ;;  %551 = vmatpush.msra.mxu0 %v525_v6  ;;  %s1026_s22 = smov (!%p230_p6, %s923_s22), 1 }
   0xf   : > { %592 = vmatpush.msra.mxu2 %v519_v2  ;;  %612 = vmatpush.msra.mxu3 %v520_v3  ;;  %v517_v8 = vld [vmem:[#allocation2 + $0x380] sm:$0xff]  ;;  %v518_v9 = vld [vmem:[#allocation2 + $0x388] sm:$0xff]  ;;  %v503_v10 = vld [vmem:[#allocation2 + $0x310] sm:$0xff]  ;;  %s793_s27 = sshll.u32 %s1026_s22, 3  ;;  %s801_s12 = sshll.u32 %s1026_s22, 6 }
  0x10   : > { %571 = vmatpush.msra.mxu1 %v526_v7  ;;  %v504_v11 = vld [vmem:[#allocation2 + $0x318] sm:$0xff]  ;;  %v509_v12 = vld [vmem:[#allocation2 + $0x340] sm:$0xff]  ;;  %v510_v13 = vld [vmem:[#allocation2 + $0x348] sm:$0xff]  ;;  %552 = vmatpush.msra.mxu0 %v517_v8  ;;  %s233_s30 = scalar_lea.vmem %s1017_s0, %s793_s27  ;;  %s238_s15 = scalar_lea.vmem %s1022_s5, %s801_s12 }
  0x11   : > { %593 = vmatpush.msra.mxu2 %v511_v4  ;;  %613 = vmatpush.msra.mxu3 %v512_v5  ;;  %v495_v14 = vld [vmem:[#allocation2 + $0x2d0] sm:$0xff]  ;;  %v496_v15 = vld [vmem:[#allocation2 + $0x2d8] sm:$0xff]  ;;  %v501_v16 = vld [vmem:[#allocation2 + $0x300] sm:$0xff] }
  0x12   : > { %572 = vmatpush.msra.mxu1 %v518_v9  ;;  %v502_v17 = vld [vmem:[#allocation2 + $0x308] sm:$0xff]  ;;  %553 = vmatpush.msra.mxu0 %v509_v12  ;;  %v487_v18 = vld [vmem:[#allocation2 + $0x290] sm:$0xff]  ;;  %v488_v19 = vld [vmem:[#allocation2 + $0x298] sm:$0xff] }
  0x13   : > { %594 = vmatpush.msra.mxu2 %v503_v10  ;;  %614 = vmatpush.msra.mxu3 %v504_v11  ;;  %v493_v20 = vld [vmem:[#allocation2 + $0x2c0] sm:$0xff]  ;;  %v494_v21 = vld [vmem:[#allocation2 + $0x2c8] sm:$0xff]  ;;  %v479_v22 = vld [vmem:[#allocation2 + $0x250] sm:$0xff] }
  0x14   : > { %573 = vmatpush.msra.mxu1 %v510_v13  ;;  %554 = vmatpush.msra.mxu0 %v501_v16  ;;  %v480_v23 = vld [vmem:[#allocation2 + $0x258] sm:$0xff]  ;;  %v485_v24 = vld [vmem:[#allocation2 + $0x280] sm:$0xff]  ;;  %v486_v25 = vld [vmem:[#allocation2 + $0x288] sm:$0xff] }
  0x15   : > { %595 = vmatpush.msra.mxu2 %v495_v14  ;;  %615 = vmatpush.msra.mxu3 %v496_v15  ;;  %v471_v26 = vld [vmem:[#allocation2 + $0x210] sm:$0xff]  ;;  %v472_v27 = vld [vmem:[#allocation2 + $0x218] sm:$0xff]  ;;  %v477_v28 = vld [vmem:[#allocation2 + $0x240] sm:$0xff] }
  0x16   : > { %574 = vmatpush.msra.mxu1 %v502_v17  ;;  %555 = vmatpush.msra.mxu0 %v493_v20  ;;  %v478_v29 = vld [vmem:[#allocation2 + $0x248] sm:$0xff]  ;;  %v463_v30 = vld [vmem:[#allocation2 + $0x1d0] sm:$0xff]  ;;  %v464_v31 = vld [vmem:[#allocation2 + $0x1d8] sm:$0xff] }
  0x17   : > { %596 = vmatpush.msra.mxu2 %v487_v18  ;;  %616 = vmatpush.msra.mxu3 %v488_v19  ;;  %v469_v32 = vld [vmem:[#allocation2 + $0x200] sm:$0xff]  ;;  %v470_v33 = vld [vmem:[#allocation2 + $0x208] sm:$0xff]  ;;  %v455_v34 = vld [vmem:[#allocation2 + $0x190] sm:$0xff] }
  0x18   : > { %575 = vmatpush.msra.mxu1 %v494_v21  ;;  %556 = vmatpush.msra.mxu0 %v485_v24  ;;  %v456_v35 = vld [vmem:[#allocation2 + $0x198] sm:$0xff]  ;;  %v461_v36 = vld [vmem:[#allocation2 + $0x1c0] sm:$0xff]  ;;  %v462_v37 = vld [vmem:[#allocation2 + $0x1c8] sm:$0xff] }
  0x19   : > { %597 = vmatpush.msra.mxu2 %v479_v22  ;;  %617 = vmatpush.msra.mxu3 %v480_v23  ;;  %v447_v38 = vld [vmem:[#allocation2 + $0x150] sm:$0xff]  ;;  %v448_v39 = vld [vmem:[#allocation2 + $0x158] sm:$0xff]  ;;  %v453_v40 = vld [vmem:[#allocation2 + $0x180] sm:$0xff] }
  0x1a   : > { %576 = vmatpush.msra.mxu1 %v486_v25  ;;  %557 = vmatpush.msra.mxu0 %v477_v28  ;;  %v454_v41 = vld [vmem:[#allocation2 + $0x188] sm:$0xff]  ;;  %v439_v42 = vld [vmem:[#allocation2 + $0x110] sm:$0xff]  ;;  %v440_v43 = vld [vmem:[#allocation2 + $0x118] sm:$0xff] }
  0x1b   : > { %598 = vmatpush.msra.mxu2 %v471_v26  ;;  %618 = vmatpush.msra.mxu3 %v472_v27  ;;  %v445_v44 = vld [vmem:[#allocation2 + $0x140] sm:$0xff]  ;;  %v446_v45 = vld [vmem:[#allocation2 + $0x148] sm:$0xff]  ;;  %v431_v46 = vld [vmem:[#allocation2 + $0xd0] sm:$0xff] }
  0x1c   : > { %577 = vmatpush.msra.mxu1 %v478_v29  ;;  %558 = vmatpush.msra.mxu0 %v469_v32  ;;  %v432_v47 = vld [vmem:[#allocation2 + $0xd8] sm:$0xff]  ;;  %v437_v48 = vld [vmem:[#allocation2 + $0x100] sm:$0xff]  ;;  %v438_v49 = vld [vmem:[#allocation2 + $0x108] sm:$0xff] }
  0x1d   : > { %599 = vmatpush.msra.mxu2 %v463_v30  ;;  %619 = vmatpush.msra.mxu3 %v464_v31  ;;  %v423_v50 = vld [vmem:[#allocation2 + $0x90] sm:$0xff]  ;;  %v424_v51 = vld [vmem:[#allocation2 + $0x98] sm:$0xff]  ;;  %v429_v52 = vld [vmem:[#allocation2 + $0xc0] sm:$0xff] }
  0x1e   : > { %578 = vmatpush.msra.mxu1 %v470_v33  ;;  %559 = vmatpush.msra.mxu0 %v461_v36  ;;  %v430_v53 = vld [vmem:[#allocation2 + $0xc8] sm:$0xff]  ;;  %v415_v54 = vld [vmem:[#allocation2 + $0x50] sm:$0xff]  ;;  %v416_v55 = vld [vmem:[#allocation2 + $0x58] sm:$0xff] }
  0x1f   : > { %600 = vmatpush.msra.mxu2 %v455_v34  ;;  %620 = vmatpush.msra.mxu3 %v456_v35  ;;  %v421_v56 = vld [vmem:[#allocation2 + $0x80] sm:$0xff]  ;;  %v422_v57 = vld [vmem:[#allocation2 + $0x88] sm:$0xff]  ;;  %v407_v58 = vld [vmem:[#allocation2 + $0x10] sm:$0xff] }
  0x20   : > { %579 = vmatpush.msra.mxu1 %v462_v37  ;;  %560 = vmatpush.msra.mxu0 %v453_v40  ;;  %v408_v59 = vld [vmem:[#allocation2 + $0x18] sm:$0xff]  ;;  %v531_v60 = vld [vmem:[#allocation2 + $0x3f0] sm:$0xff]  ;;  %v413_v62 = vld [vmem:[#allocation2 + $0x40] sm:$0xff] }
  0x21   : > { %601 = vmatpush.msra.mxu2 %v447_v38  ;;  %621 = vmatpush.msra.mxu3 %v448_v39  ;;  %v532_v61 = vld [vmem:[#allocation2 + $0x3f8] sm:$0xff]  ;;  %v414_v63 = vld [vmem:[#allocation2 + $0x48] sm:$0xff]  ;;  %v523_v0 = vld [vmem:[#allocation2 + $0x3b0] sm:$0xff] }
  0x22   : > { %580 = vmatpush.msra.mxu1 %v454_v41  ;;  %561 = vmatpush.msra.mxu0 %v445_v44  ;;  %v524_v1 = vld [vmem:[#allocation2 + $0x3b8] sm:$0xff]  ;;  %v515_v2 = vld [vmem:[#allocation2 + $0x370] sm:$0xff]  ;;  %v405_v3 = vld [vmem:[#allocation2] sm:$0xff] }
  0x23   : > { %602 = vmatpush.msra.mxu2 %v439_v42  ;;  %622 = vmatpush.msra.mxu3 %v440_v43  ;;  %v406_v4 = vld [vmem:[#allocation2 + $0x8] sm:$0xff]  ;;  %v516_v5 = vld [vmem:[#allocation2 + $0x378] sm:$0xff]  ;;  %v529_v6 = vld [vmem:[#allocation2 + $0x3e0] sm:$0xff] }
  0x24   : > { %581 = vmatpush.msra.mxu1 %v446_v45  ;;  %562 = vmatpush.msra.mxu0 %v437_v48  ;;  %v530_v7 = vld [vmem:[#allocation2 + $0x3e8] sm:$0xff]  ;;  %v507_v8 = vld [vmem:[#allocation2 + $0x330] sm:$0xff]  ;;  %v508_v9 = vld [vmem:[#allocation2 + $0x338] sm:$0xff] }
  0x25   : > { %603 = vmatpush.msra.mxu2 %v431_v46  ;;  %623 = vmatpush.msra.mxu3 %v432_v47  ;;  %v521_v10 = vld [vmem:[#allocation2 + $0x3a0] sm:$0xff]  ;;  %v522_v11 = vld [vmem:[#allocation2 + $0x3a8] sm:$0xff]  ;;  %v499_v15 = vld [vmem:[#allocation2 + $0x2f0] sm:$0xff] }
  0x26   : > { %582 = vmatpush.msra.mxu1 %v438_v49  ;;  %563 = vmatpush.msra.mxu0 %v429_v52  ;;  %v239_v12 = vld [vmem:[%s233_s30] sm:$0xff]  ;;  %v500_v16 = vld [vmem:[#allocation2 + $0x2f8] sm:$0xff]  ;;  %v514_v18 = vld [vmem:[#allocation2 + $0x368] sm:$0xff] }
  0x27   : > { %604 = vmatpush.msra.mxu2 %v423_v50  ;;  %624 = vmatpush.msra.mxu3 %v424_v51  ;;  %v830_v13 = vld [vmem:[%s1018_s1] ss:$0 sm:$0xff]  ;;  %v491_v20 = vld [vmem:[#allocation2 + $0x2b0] sm:$0xff]  ;;  %v492_v21 = vld [vmem:[#allocation2 + $0x2b8] sm:$0xff] }
  0x28   : > { %583 = vmatpush.msra.mxu1 %v430_v53  ;;  %564 = vmatpush.msra.mxu0 %v421_v56  ;;  %v831_v14 = vld [vmem:[%s1019_s2] ss:$0 sm:$0xff]  ;;  %v244_v19 = vmul.f32 %v830_v13, %v239_v12  ;;  %v506_v23 = vld [vmem:[#allocation2 + $0x328] sm:$0xff]  ;;  %v483_v25 = vld [vmem:[#allocation2 + $0x270] sm:$0xff] }
  0x29   : > { %605 = vmatpush.msra.mxu2 %v415_v54  ;;  %625 = vmatpush.msra.mxu3 %v416_v55  ;;  %v513_v17 = vld [vmem:[#allocation2 + $0x360] sm:$0xff]  ;;  %v484_v26 = vld [vmem:[#allocation2 + $0x278] sm:$0xff]  ;;  %v498_v28 = vld [vmem:[#allocation2 + $0x2e8] sm:$0xff] }
  0x2a   : > { %584 = vmatpush.msra.mxu1 %v422_v57  ;;  %565 = vmatpush.msra.mxu0 %v413_v62  ;;  %v505_v22 = vld [vmem:[#allocation2 + $0x320] sm:$0xff]  ;;  %v944_v24 = vadd.f32 %v831_v14, %v244_v19  ;;  %v475_v30 = vld [vmem:[#allocation2 + $0x230] sm:$0xff]  ;;  %v476_v31 = vld [vmem:[#allocation2 + $0x238] sm:$0xff]  ;;  %v879_v62 = vmov 2131351028  }
  0x2b   : > { %606 = vmatpush.msra.mxu2 %v407_v58  ;;  %626 = vmatpush.msra.mxu3 %v408_v59  ;;  %v497_v27 = vld [vmem:[#allocation2 + $0x2e0] sm:$0xff]  ;;  %v490_v33 = vld [vmem:[#allocation2 + $0x2a8] sm:$0xff]  ;;  %v467_v35 = vld [vmem:[#allocation2 + $0x1f0] sm:$0xff]  ;;  %v877_v58 = vmov 683565275  }
  0x2c   : > { %585 = vmatpush.msra.mxu1 %v414_v63  ;;  %566 = vmatpush.msra.mxu0 %v405_v3  ;;  %v253_v29 = vand.u32 2139095040, %v944_v24  ;;  %v489_v32 = vld [vmem:[#allocation2 + $0x2a0] sm:$0xff]  ;;  %v468_v36 = vld [vmem:[#allocation2 + $0x1f8] sm:$0xff]  ;;  %v250_v37 = vand.u32 2147483647, %v944_v24  ;;  %v482_v39 = vld [vmem:[#allocation2 + $0x268] sm:$0xff] }
  0x2d   : > { %671 = vmatpush.msrb.mxu2 %v531_v60  ;;  %691 = vmatpush.msrb.mxu3 %v532_v61  ;;  %v481_v38 = vld [vmem:[#allocation2 + $0x260] sm:$0xff]  ;;  %v459_v41 = vld [vmem:[#allocation2 + $0x1b0] sm:$0xff]  ;;  %v460_v42 = vld [vmem:[#allocation2 + $0x1b8] sm:$0xff]  ;;  %v878_v60 = vmov 2475754826   ;;  %vm252_vm12 = vcmp.lt.s32.totalorder %v944_v24, 0 }
  0x2e   : > { %586 = vmatpush.msra.mxu1 %v406_v4  ;;  %631 = vmatpush.msrb.mxu0 %v529_v6  ;;  %v254_v34 = vshrl.u32 %v253_v29, 23  ;;  %v473_v43 = vld [vmem:[#allocation2 + $0x220] sm:$0xff]  ;;  %v474_v44 = vld [vmem:[#allocation2 + $0x228] sm:$0xff]  ;;  %v451_v46 = vld [vmem:[#allocation2 + $0x170] sm:$0xff]  ;;  %v257_v48 = vand.u32 8388607, %v250_v37 }
  0x2f   : > { %672 = vmatpush.msrb.mxu2 %v523_v0  ;;  %692 = vmatpush.msrb.mxu3 %v524_v1  ;;  %v452_v47 = vld [vmem:[#allocation2 + $0x178] sm:$0xff]  ;;  %v465_v49 = vld [vmem:[#allocation2 + $0x1e0] sm:$0xff]  ;;  %v466_v50 = vld [vmem:[#allocation2 + $0x1e8] sm:$0xff]  ;;  %v880_v0 = vmov 2102212464  }
  0x30   : > { %651 = vmatpush.msrb.mxu1 %v530_v7  ;;  %632 = vmatpush.msrb.mxu0 %v521_v10  ;;  %v796_v40 = vadd.s32 4294967169, %v254_v34  ;;  %v443_v51 = vld [vmem:[#allocation2 + $0x130] sm:$0xff]  ;;  %v444_v52 = vld [vmem:[#allocation2 + $0x138] sm:$0xff]  ;;  %v258_v55 = vor.u32 8388608, %v257_v48  ;;  %v883_v48 = vmov 0  }
  0x31   : > { %673 = vmatpush.msrb.mxu2 %v515_v2  ;;  %693 = vmatpush.msrb.mxu3 %v516_v5  ;;  %v881_v2 = vmov 920167782   ;;  %vm992_vm13 = vcmp.le.f32.partialorder %v250_v37, 0.7853982 }
  0x32   : > { %652 = vmatpush.msrb.mxu1 %v522_v11  ;;  %633 = vmatpush.msrb.mxu0 %v513_v17  ;;  %v260_v45 = vadd.s32 1, %v796_v40  ;;  %v953_v10 = vshll.u32 %v258_v55, 8 }
  0x33   : > { %674 = vmatpush.msrb.mxu2 %v507_v8  ;;  %694 = vmatpush.msrb.mxu3 %v508_v9  ;;  %v882_v8 = vmov 1326507024  }
  0x34   : > { %653 = vmatpush.msrb.mxu1 %v514_v18  ;;  %634 = vmatpush.msrb.mxu0 %v505_v22  ;;  %vm261_vm0 = vcmp.gt.s32.totalorder %v260_v45, 0  ;;  %v299_v22 = vand.u32 65535, %v953_v10 }
  0x35   : > { %675 = vmatpush.msrb.mxu2 %v499_v15  ;;  %695 = vmatpush.msrb.mxu3 %v500_v16  ;;  %v262_v53 = vsel %vm261_vm0, %v260_v45, 0 }
  0x36   : > { %654 = vmatpush.msrb.mxu1 %v506_v23  ;;  %635 = vmatpush.msrb.mxu0 %v497_v27  ;;  %v264_v54 = vand.u32 31, %v262_v53  ;;  %v950_v56 = vshrl.u32 %v262_v53, 5  ;;  %v300_v23 = vshrl.u32 %v953_v10, 16 }
  0x37   : > { %676 = vmatpush.msrb.mxu2 %v491_v20  ;;  %696 = vmatpush.msrb.mxu3 %v492_v21 }
  0x38   : > { %655 = vmatpush.msrb.mxu1 %v498_v28  ;;  %636 = vmatpush.msrb.mxu0 %v489_v32  ;;  %v265_v57 = vsub.s32 32, %v264_v54  ;;  %v267_v59 = vshll.u32 %v877_v58, %v264_v54  ;;  %v270_v61 = vshll.u32 %v878_v60, %v264_v54  ;;  %v273_v63 = vshll.u32 %v879_v62, %v264_v54 }
  0x39   : > { %677 = vmatpush.msrb.mxu2 %v483_v25  ;;  %697 = vmatpush.msrb.mxu3 %v484_v26  ;;  %v276_v1 = vshll.u32 %v880_v0, %v264_v54  ;;  %v279_v3 = vshll.u32 %v881_v2, %v264_v54  ;;  %vm282_vm1 = vcmp.lt.s32.totalorder %v950_v56, 1  ;;  %vm285_vm2 = vcmp.lt.s32.totalorder %v950_v56, 4 }
  0x3a   : > { %656 = vmatpush.msrb.mxu1 %v490_v33  ;;  %637 = vmatpush.msrb.mxu0 %v481_v38  ;;  %v268_v4 = vshrl.u32 %v878_v60, %v265_v57  ;;  %v271_v5 = vshrl.u32 %v879_v62, %v265_v57  ;;  %v274_v6 = vshrl.u32 %v880_v0, %v265_v57  ;;  %vm284_vm3 = vcmp.lt.s32.totalorder %v950_v56, 3 }
  0x3b   : > { %678 = vmatpush.msrb.mxu2 %v475_v30  ;;  %698 = vmatpush.msrb.mxu3 %v476_v31  ;;  %v277_v7 = vshrl.u32 %v881_v2, %v265_v57  ;;  %v280_v9 = vshrl.u32 %v882_v8, %v265_v57  ;;  %vm283_vm4 = vcmp.lt.s32.totalorder %v950_v56, 2  ;;  %v266_v31 = vshrl.u32 %v877_v58, %v265_v57 }
  0x3c   : > { %657 = vmatpush.msrb.mxu1 %v482_v39  ;;  %638 = vmatpush.msrb.mxu0 %v473_v43  ;;  %v269_v11 = vor.u32 %v268_v4, %v267_v59  ;;  %v272_v12 = vor.u32 %v271_v5, %v270_v61  ;;  %v275_v13 = vor.u32 %v274_v6, %v273_v63 }
  0x3d   : > { %679 = vmatpush.msrb.mxu2 %v467_v35  ;;  %699 = vmatpush.msrb.mxu3 %v468_v36  ;;  %v278_v14 = vor.u32 %v277_v7, %v276_v1  ;;  %v281_v15 = vor.u32 %v280_v9, %v279_v3 }
  0x3e   : > { %658 = vmatpush.msrb.mxu1 %v474_v44  ;;  %639 = vmatpush.msrb.mxu0 %v465_v49  ;;  %v290_v16 = vsel %vm282_vm1, %v269_v11, %v272_v12  ;;  %v294_v17 = vsel %vm282_vm1, %v272_v12, %v275_v13  ;;  %v286_v45 = vsel %vm282_vm1, %v266_v31, %v269_v11  ;;  %vm393_vm1 = vweird.f32 %v944_v24 }
  0x3f   : > { %680 = vmatpush.msrb.mxu2 %v459_v41  ;;  %700 = vmatpush.msrb.mxu3 %v460_v42  ;;  %v291_v18 = vsel %vm285_vm2, %v278_v14, 920167782  ;;  %v295_v19 = vsel %vm285_vm2, %v281_v15, 1326507024 }
  0x40   : > { %659 = vmatpush.msrb.mxu1 %v466_v50  ;;  %v292_v20 = vsel %vm284_vm3, %v275_v13, %v291_v18  ;;  %v296_v21 = vsel %vm284_vm3, %v278_v14, %v295_v19 }
  0x41   : > { %681 = vmatpush.msrb.mxu2 %v451_v46  ;;  %701 = vmatpush.msrb.mxu3 %v452_v47  ;;  %v293_v25 = vsel %vm283_vm4, %v290_v16, %v292_v20  ;;  %v297_v26 = vsel %vm283_vm4, %v294_v17, %v296_v21  ;;  %v287_v47 = vsel %vm285_vm2, %v275_v13, 2102212464 }
  0x42   : > { %v301_v27 = vand.u32 65535, %v297_v26  ;;  %v302_v28 = vshrl.u32 %v297_v26, 16  ;;  %v323_v29 = vand.u32 65535, %v293_v25  ;;  %v324_v30 = vshrl.u32 %v293_v25, 16 }
  0x43   : > { %682 = vmatpush.msrb.mxu2 %v443_v51  ;;  %702 = vmatpush.msrb.mxu3 %v444_v52  ;;  %v288_v58 = vsel %vm284_vm3, %v272_v12, %v287_v47  ;;  %v412_v47 = vld [vmem:[#allocation2 + $0x38] sm:$0xff] }
  0x44   : > { %v303_v32 = vmul.u32 %v301_v27, %v299_v22  ;;  %v304_v33 = vmul.u32 %v302_v28, %v299_v22  ;;  %v305_v34 = vmul.u32 %v301_v27, %v300_v23  ;;  %v325_v35 = vmul.u32 %v323_v29, %v299_v22  ;;  %v457_v27 = vld [vmem:[#allocation2 + $0x1a0] sm:$0xff] }
  0x45   : > { %v326_v36 = vmul.u32 %v324_v30, %v299_v22  ;;  %v327_v38 = vmul.u32 %v323_v29, %v300_v23  ;;  %v306_v39 = vmul.u32 %v302_v28, %v300_v23  ;;  %v328_v42 = vmul.u32 %v324_v30, %v300_v23  ;;  %v458_v28 = vld [vmem:[#allocation2 + $0x1a8] sm:$0xff]  ;;  %v435_v29 = vld [vmem:[#allocation2 + $0xf0] sm:$0xff]  ;;  %640 = vmatpush.msrb.mxu0 %v457_v27 }
  0x46   : > { %v307_v40 = vshll.u32 %v304_v33, 16  ;;  %v309_v41 = vshll.u32 %v305_v34, 16  ;;  %v308_v51 = vshrl.u32 %v304_v33, 16  ;;  %v310_v59 = vshrl.u32 %v305_v34, 16  ;;  %660 = vmatpush.msrb.mxu1 %v458_v28  ;;  %v449_v33 = vld [vmem:[#allocation2 + $0x160] sm:$0xff]  ;;  %v450_v34 = vld [vmem:[#allocation2 + $0x168] sm:$0xff]  ;;  %683 = vmatpush.msrb.mxu2 %v435_v29 }
  0x47   : > { %v329_v43 = vshll.u32 %v326_v36, 16  ;;  %v331_v44 = vshll.u32 %v327_v38, 16  ;;  %v330_v55 = vshrl.u32 %v326_v36, 16  ;;  %v332_v62 = vshrl.u32 %v327_v38, 16  ;;  %v428_v36 = vld [vmem:[#allocation2 + $0xb8] sm:$0xff]  ;;  %v441_v38 = vld [vmem:[#allocation2 + $0x120] sm:$0xff]  ;;  %641 = vmatpush.msrb.mxu0 %v449_v33 }
  0x48   : > { %vm311_vm5 = vc.u32 %v303_v32, %v307_v40  ;;  %v313_v46 = vadd.s32 %v307_v40, %v303_v32  ;;  %v289_v2 = vsel %vm283_vm4, %v286_v45, %v288_v58  ;;  %v436_v32 = vld [vmem:[#allocation2 + $0xf8] sm:$0xff]  ;;  %661 = vmatpush.msrb.mxu1 %v450_v34  ;;  %v442_v40 = vld [vmem:[#allocation2 + $0x128] sm:$0xff]  ;;  %v409_v58 = vld [vmem:[#allocation2 + $0x20] sm:$0xff] }
  0x49   : > { %v312_v49 = vsel %vm311_vm5, 1, %v883_v48  ;;  %vm333_vm6 = vc.u32 %v325_v35, %v329_v43  ;;  %v335_v50 = vadd.s32 %v329_v43, %v325_v35  ;;  %v343_v6 = vmul.u32 %v953_v10, %v289_v2  ;;  %703 = vmatpush.msrb.mxu3 %v436_v32  ;;  %v427_v35 = vld [vmem:[#allocation2 + $0xb0] sm:$0xff]  ;;  %v433_v43 = vld [vmem:[#allocation2 + $0xe0] sm:$0xff]  ;;  %642 = vmatpush.msrb.mxu0 %v441_v38 }
  0x4a   : > { %v314_v52 = vadd.s32 %v312_v49, %v306_v39  ;;  %vm315_vm7 = vc.u32 %v313_v46, %v309_v41  ;;  %v334_v53 = vsel %vm333_vm6, 1, %v883_v48  ;;  %v419_v41 = vld [vmem:[#allocation2 + $0x70] sm:$0xff]  ;;  %684 = vmatpush.msrb.mxu2 %v427_v35  ;;  %662 = vmatpush.msrb.mxu1 %v442_v40 }
  0x4b   : > { %v316_v54 = vsel %vm315_vm7, 1, %v883_v48  ;;  %v336_v57 = vadd.s32 %v334_v53, %v328_v42  ;;  %vm337_vm8 = vc.u32 %v335_v50, %v331_v44  ;;  %v339_v1 = vadd.s32 %v335_v50, %v331_v44  ;;  %v420_v42 = vld [vmem:[#allocation2 + $0x78] sm:$0xff]  ;;  %704 = vmatpush.msrb.mxu3 %v428_v36  ;;  %v434_v44 = vld [vmem:[#allocation2 + $0xe8] sm:$0xff]  ;;  %v411_v46 = vld [vmem:[#allocation2 + $0x30] sm:$0xff]  ;;  %643 = vmatpush.msrb.mxu0 %v433_v43 }
  0x4c   : > { %v318_v60 = vadd.s32 %v316_v54, %v314_v52  ;;  %v338_v61 = vsel %vm337_vm8, 1, %v883_v48  ;;  %685 = vmatpush.msrb.mxu2 %v419_v41  ;;  %663 = vmatpush.msrb.mxu1 %v434_v44  ;;  %v426_v52 = vld [vmem:[#allocation2 + $0xa8] sm:$0xff]  ;;  %v417_v53 = vld [vmem:[#allocation2 + $0x60] sm:$0xff] }
  0x4d   : > { %v340_v63 = vadd.s32 %v338_v61, %v336_v57  ;;  %705 = vmatpush.msrb.mxu3 %v420_v42 }
  0x4e   : > { %v319_v0 = vadd.s32 %v318_v60, %v308_v51  ;;  %686 = vmatpush.msrb.mxu2 %v411_v46  ;;  %v425_v51 = vld [vmem:[#allocation2 + $0xa0] sm:$0xff]  ;;  %664 = vmatpush.msrb.mxu1 %v426_v52 }
  0x4f   : > { %v341_v3 = vadd.s32 %v340_v63, %v330_v55  ;;  %706 = vmatpush.msrb.mxu3 %v412_v47  ;;  %644 = vmatpush.msrb.mxu0 %v425_v51  ;;  %v418_v55 = vld [vmem:[#allocation2 + $0x68] sm:$0xff] }
  0x50   : > { %v320_v4 = vadd.s32 %v319_v0, %v310_v59  ;;  %v410_v59 = vld [vmem:[#allocation2 + $0x28] sm:$0xff]  ;;  %665 = vmatpush.msrb.mxu1 %v418_v55 }
  0x51   : > { %v342_v5 = vadd.s32 %v341_v3, %v332_v62  ;;  %645 = vmatpush.msrb.mxu0 %v417_v53 }
  0x52   : > { %vm345_vm9 = vc.u32 %v320_v4, %v339_v1  ;;  %v344_v18 = vadd.s32 %v339_v1, %v320_v4  ;;  %666 = vmatpush.msrb.mxu1 %v410_v59 }
  0x53   : > { %v346_v7 = vadd.s32 1, %v342_v5  ;;  %646 = vmatpush.msrb.mxu0 %v409_v58 }
  0x55   : > { %v347_v8 = vsel %vm345_vm9, %v346_v7, %v342_v5 }
  0x56   : > { %v348_v9 = vadd.s32 %v347_v8, %v343_v6 }
  0x58   : > { %v349_v11 = vadd.s32 536870912, %v348_v9 }
  0x5a   : > { %v985_v12 = vshrl.u32 %v349_v11, 30 }
  0x5c   : > { %v351_v13 = vshll.u32 %v985_v12, 30  ;;  %v374_v48 = vsub.s32 4, %v985_v12 }
  0x5e   : > { %v352_v14 = vsub.s32 %v348_v9, %v351_v13  ;;  %v375_v37 = vsel %vm252_vm12, %v374_v48, %v985_v12 }
  0x5f   : > { %v377_v61 = vsel %vm992_vm13, 0, %v375_v37 }
  0x60   : > { %vm353_vm10 = vcmp.lt.s32.totalorder %v352_v14, 0  ;;  %v354_v15 = vsub.s32 0, %v352_v14  ;;  %v394_v2 = vadd.s32 3, %v377_v61 }
  0x62   : > { %v355_v16 = vsel %vm353_vm10, %v354_v15, %v352_v14  ;;  %v395_v7 = vand.u32 3, %v394_v2 }
  0x63   : > { %v356_v56 = vclz %v355_v16 }
  0x64   : > { %vm400_vm14 = vcmp.eq.s32.totalorder %v395_v7, 2  ;;  %vm397_vm15 = vcmp.eq.s32.totalorder %v395_v7, 0  ;;  %vm396_vm0 = vcmp.lt.s32.totalorder %v395_v7, 2 }
  0x65   : > { %v797_v17 = vadd.s32 4294967294, %v356_v56 }
  0x67   : > { %vm798_vm11 = vcmp.lt.s32.totalorder %v797_v17, 0 }
  0x68   : > { %v359_v19 = vsel %vm798_vm11, 0, %v797_v17 }
  0x69   : > { %v360_v20 = vsub.s32 32, %v359_v19  ;;  %v361_v10 = vshll.u32 %v352_v14, %v359_v19  ;;  %v364_v21 = vsub.s32 4294967266, %v359_v19  ;;  %v533_v19 = vld [vmem:[%s1021_s4] sm:$0xff] }
  0x6a   : > { %v539_v29 = vperm.slane %v533_v19, 4  ;;  %v541_v38 = vperm.slane %v533_v19, 6 }
  0x6b   : > { %v362_v22 = vshrl.u32 %v344_v18, %v360_v20  ;;  %v365_v23 = vadd.s32 127, %v364_v21  ;;  %v535_v20 = vperm.slane %v533_v19, 0 }
  0x6d   : > { %v363_v25 = vor.u32 %v362_v22, %v361_v10  ;;  %v366_v26 = vshll.u32 %v365_v23, 23  ;;  %v536_v10 = vperm.slane %v533_v19, 1 }
  0x6f   : > { %v367_v30 = vor.u32 4788187, %v366_v26  ;;  %v370_v31 = vcvt.s32.f32 %v363_v25  ;;  %v537_v25 = vperm.slane %v533_v19, 2  ;;  %v538_v26 = vperm.slane %v533_v19, 3 }
  0x71   : > { %v368_v39 = vand.u32 2147483647, %v367_v30  ;;  %v540_v30 = vperm.slane %v533_v19, 5 }
  0x73   : > { %v371_v45 = vmul.f32 %v370_v31, %v368_v39  ;;  %v542_v39 = vperm.slane %v533_v19, 7 }
  0x75   : > { %v372_v50 = vxor.u32 2147483648, %v371_v45 }
  0x77   : > { %v373_v54 = vsel %vm252_vm12, %v372_v50, %v371_v45 }
  0x78   : > { %v376_v57 = vsel %vm992_vm13, %v944_v24, %v373_v54 }
  0x79   : > { %v378_v60 = vmul.f32 %v376_v57, %v376_v57 }
  0x7b   : > { %v379_v62 = vmul.f32 -0.001358992, %v378_v60  ;;  %v386_v63 = vmul.f32 -0.00019511016, %v378_v60 }
  0x7d   : > { %v380_v0 = vadd.f32 0.041655596, %v379_v62  ;;  %v387_v1 = vadd.f32 0.008332121, %v386_v63 }
  0x7f   : > { %v381_v3 = vmul.f32 %v380_v0, %v378_v60  ;;  %v388_v4 = vmul.f32 %v387_v1, %v378_v60 }
  0x81   : > { %v382_v5 = vadd.f32 -0.4999988, %v381_v3  ;;  %v389_v6 = vadd.f32 -0.16666654, %v388_v4 }
  0x83   : > { %v383_v8 = vmul.f32 %v382_v5, %v378_v60  ;;  %v390_v9 = vmul.f32 %v389_v6, %v378_v60 }
  0x85   : > { %v384_v11 = vadd.f32 1.0, %v383_v8  ;;  %v391_v12 = vadd.f32 1.0, %v390_v9 }
  0x87   : > { %v392_v13 = vmul.f32 %v391_v12, %v376_v57  ;;  %v401_v14 = vxor.u32 2147483648, %v384_v11 }
  0x89   : > { %v398_v15 = vxor.u32 2147483648, %v392_v13  ;;  %v402_v16 = vsel %vm400_vm14, %v401_v14, %v392_v13 }
  0x8b   : > { %v399_v56 = vsel %vm397_vm15, %v384_v11, %v398_v15 }
  0x8c   : > { %v403_v17 = vsel %vm396_vm0, %v399_v56, %v402_v16 }
  0x8d   : > { %v404_v18 = vsel %vm393_vm1, nan, %v403_v17 }
  0x8e   : > { %607 = vmatmul.f32.vlgmr.msra.gmra.mxu2 %v404_v18  ;;  %627 = vmatmul.f32.vlgmr.msra.gmra.mxu3 %v404_v18 }
  0x8f   : > { %567 = vmatmul.f32.vlgmr.msra.gmra.mxu0 %v404_v18  ;;  %587 = vmatmul.f32.vlgmr.msra.gmra.mxu1 %v404_v18 }
  0x96   : > { %687 = vmatmul.f32.vlgmr.msrb.gmra.mxu2 %v404_v18  ;;  %707 = vmatmul.f32.vlgmr.msrb.gmra.mxu3 %v404_v18 }
  0x97   : > { %647 = vmatmul.f32.vlgmr.msrb.gmra.mxu0 %v404_v18  ;;  %667 = vmatmul.f32.vlgmr.msrb.gmra.mxu1 %v404_v18 }
 0x10c   : > { %v568_v24 = vpop.f32.mrf.mxu0  ;;  %v588_v21 = vpop.f32.mrf.mxu1 }
 0x10d   : > { %v569_v22 = vadd.f32 %v568_v24, %v535_v20  ;;  %v589_v23 = vadd.f32 %v588_v21, %v536_v10 }
 0x10f   : > { %711 = vst [vmem:[%s238_s15] sm:$0xff] %v569_v22 }
 0x110   : > { %712 = vst [vmem:[%s238_s15 + $0x8] sm:$0xff] %v589_v23 }
 0x111   : > { %v608_v27 = vpop.f32.mrf.mxu2  ;;  %v628_v28 = vpop.f32.mrf.mxu3 }
 0x112   : > { %v609_v31 = vadd.f32 %v608_v27, %v537_v25  ;;  %v629_v32 = vadd.f32 %v628_v28, %v538_v26 }
 0x114   : > { %713 = vst [vmem:[%s238_s15 + $0x10] sm:$0xff] %v609_v31  ;;  %v648_v33 = vpop.f32.mrf.mxu0  ;;  %v668_v34 = vpop.f32.mrf.mxu1 }
 0x115   : > { %714 = vst [vmem:[%s238_s15 + $0x18] sm:$0xff] %v629_v32  ;;  %v649_v35 = vadd.f32 %v648_v33, %v539_v29  ;;  %v669_v36 = vadd.f32 %v668_v34, %v540_v30 }
 0x117   : > { %715 = vst [vmem:[%s238_s15 + $0x20] sm:$0xff] %v649_v35 }
 0x118   : > { %716 = vst [vmem:[%s238_s15 + $0x28] sm:$0xff] %v669_v36 }
 0x119   : > { %v688_v40 = vpop.f32.mrf.mxu2  ;;  %v708_v41 = vpop.f32.mrf.mxu3 }
 0x11a   : > { %v689_v42 = vadd.f32 %v688_v40, %v541_v38  ;;  %v709_v43 = vadd.f32 %v708_v41, %v542_v39 }
 0x11c   : > { %717 = vst [vmem:[%s238_s15 + $0x30] sm:$0xff] %v689_v42 }
 0x11d   : > { %718 = vst [vmem:[%s238_s15 + $0x38] sm:$0xff] %v709_v43 }
 0x11e PF: > { %s16_s18 = sadd.s32 1, %s872_s18  }
 0x11f   : > { %p13_p7 = scmp.ge.s32.totalorder %s16_s18, 4  }
 0x121   :  { %15 = sbr.rel (!%p13_p7) target bundleno = 1 (0x1), region = 75 }
 0x126   :  { %740 = vsyncpa [#allocation3], 1 }
 0x127   :  { %742 = vsyncpa [#allocation3 + $0x1], 1 }

</bundles_post_ra>
